<compile_context>
chip_gen: v5e
topology: v5e:2x2
jax: 0.10.0
libtpu: 0.0.40
codegen_flags: <defaults>
</compile_context>

<pallas_src>
import jax
import jax.numpy as jnp
from jax.experimental import pallas as pl
from jax.experimental.pallas import tpu as pltpu

_VMEM_LIMIT = 32 * 1024 * 1024  # safe on v5e/v6e (128 MiB phys) and v7x (64 MiB)


def _make_divisible(v, divisor, min_value=None):
    if min_value is None:
        min_value = divisor
    new_v = max(min_value, int(v + divisor / 2) // divisor * divisor)
    if new_v < 0.9 * v:
        new_v += divisor
    return new_v


def _round_up(a, m):
    return (a + m - 1) // m * m


# ---------------------------------------------------------------------------
# Fused single-pass kernel: pool -> MLP -> sigmoid gate -> scale, one grid step.
# ---------------------------------------------------------------------------
def _make_fused_kernel(inv_hw):
    def kernel(x_ref, w1_ref, b1_ref, w2_ref, b2_ref, o_ref):
        # x_ref/o_ref: (tb, C, HW); w1_ref: (C, Hid); w2_ref: (Hid, C).
        x = x_ref[...]
        # Global average pool over the spatial (lane) axis, f32 accumulation.
        means = jnp.sum(x.astype(jnp.float32), axis=-1) * inv_hw        # (tb, C)
        # Tiny excitation MLP: Linear -> SiLU -> Linear -> Sigmoid (f32).
        h = jnp.dot(means, w1_ref[...],
                    preferred_element_type=jnp.float32) + b1_ref[...]   # (tb, Hid)
        h = h * jax.nn.sigmoid(h)                                       # SiLU
        g = jax.nn.sigmoid(
            jnp.dot(h, w2_ref[...],
                    preferred_element_type=jnp.float32) + b2_ref[...])  # (tb, C)
        # Per-(batch, channel) rescale; x is never re-read from HBM.
        o_ref[...] = x * g[:, :, None].astype(x.dtype)
    return kernel


# ---------------------------------------------------------------------------
# Two-pass fallback, phase 1: row sums over the spatial axis (no padding; the
# ragged column tail of the boundary block is masked in-kernel).
# ---------------------------------------------------------------------------
def _make_pool_kernel(hw, tc, mask_tail):
    def kernel(x_ref, sum_ref):
        # x_ref: (tr, tc); sum_ref: (tr, 1) f32, resident across the col axis.
        @pl.when(pl.program_id(1) == 0)
        def _():
            sum_ref[...] = jnp.zeros_like(sum_ref)

        x = x_ref[...].astype(jnp.float32)
        if mask_tail:
            col = (pl.program_id(1) * tc
                   + jax.lax.broadcasted_iota(jnp.int32, x.shape, 1))
            x = jnp.where(col < hw, x, 0.0)
        sum_ref[...] += jnp.sum(x, axis=1, keepdims=True)
    return kernel


# ---------------------------------------------------------------------------
# Two-pass fallback, phase 3: per-row rescale by the precomputed gate.
# Gate is pre-cast to x.dtype in the wrapper -> pure VPU multiply.
# ---------------------------------------------------------------------------
def _scale_kernel(x_ref, g_ref, o_ref):
    o_ref[...] = x_ref[...] * g_ref[...]


def se_layer(x, w1, b1, w2, b2, *,
             max_row_tile=256, max_col_tile=4096,
             fused_step_bytes=4 * 1024 * 1024,
             fused_slab_limit_bytes=6 * 1024 * 1024):
    """SELayer forward. x: (B, C, H, W). Weights in PyTorch nn.Linear layout:
    w1 (Hid, C), b1 (Hid,), w2 (C, Hid), b2 (C,)."""
    B, C, H, W = x.shape
    HW = H * W
    R = B * C
    dtype = x.dtype
    itemsize = jnp.dtype(dtype).itemsize
    slab_bytes = C * HW * itemsize  # one batch element's feature map

    # ------------------------------------------------------------------
    # Fused single-pass path: whole batch-stripe resident in VMEM.
    # ------------------------------------------------------------------
    if slab_bytes <= fused_slab_limit_bytes:
        Hid = w1.shape[0]
        tb = max(1, min(B, fused_step_bytes // max(slab_bytes, 1)))
        if B >= 2:
            tb = min(tb, (B + 1) // 2)  # >=2 grid steps -> both TCs get work
        x3 = x.reshape(B, C, HW)        # metadata-only reshape
        w1t = w1.astype(jnp.float32).T              # (C, Hid)
        w2t = w2.astype(jnp.float32).T              # (Hid, C)
        b1r = b1.astype(jnp.float32).reshape(1, Hid)
        b2r = b2.astype(jnp.float32).reshape(1, C)

        out3 = pl.pallas_call(
            _make_fused_kernel(1.0 / HW),
            out_shape=jax.ShapeDtypeStruct((B, C, HW), dtype),
            grid=(pl.cdiv(B, tb),),
            in_specs=[
                pl.BlockSpec((tb, C, HW), lambda i: (i, 0, 0)),
                pl.BlockSpec((C, Hid), lambda i: (0, 0)),
                pl.BlockSpec((1, Hid), lambda i: (0, 0)),
                pl.BlockSpec((Hid, C), lambda i: (0, 0)),
                pl.BlockSpec((1, C), lambda i: (0, 0)),
            ],
            out_specs=pl.BlockSpec((tb, C, HW), lambda i: (i, 0, 0)),
            compiler_params=pltpu.CompilerParams(
                dimension_semantics=("parallel",),
                vmem_limit_bytes=_VMEM_LIMIT),
        )(x3, w1t, b1r, w2t, b2r)
        return out3.reshape(B, C, H, W)

    # ------------------------------------------------------------------
    # Two-pass streaming fallback (very large C*H*W slabs).
    # ------------------------------------------------------------------
    x2 = x.reshape(R, HW)  # rows = B*C -> sublanes, cols = H*W -> lanes
    sub = {4: 8, 2: 16, 1: 32}.get(itemsize, 8)
    tc = min(_round_up(HW, 128), max_col_tile)
    tr = min(_round_up(R, sub), max_row_tile)
    # Guarantee >=2 row blocks when possible so the pool's parallel (row) axis
    # can be sharded across both TensorCores on dual-core chips.
    if pl.cdiv(R, tr) < 2 and R > sub:
        tr = _round_up(pl.cdiv(R, 2), sub)
    grid = (pl.cdiv(R, tr), pl.cdiv(HW, tc))
    mask_tail = (HW % tc) != 0

    # Phase 1: pooled row sums (f32).  Boundary-row garbage never contaminates
    # valid rows (row-wise reduction) and is dropped at writeback.
    sums = pl.pallas_call(
        _make_pool_kernel(HW, tc, mask_tail),
        out_shape=jax.ShapeDtypeStruct((R, 1), jnp.float32),
        grid=grid,
        in_specs=[pl.BlockSpec((tr, tc), lambda i, j: (i, j))],
        out_specs=pl.BlockSpec((tr, 1), lambda i, j: (i, 0)),
        compiler_params=pltpu.CompilerParams(
            dimension_semantics=("parallel", "arbitrary"),
            vmem_limit_bytes=_VMEM_LIMIT),
    )(x2)

    # Phase 2: tiny excitation MLP, hoisted out of the kernel (negligible FLOPs).
    y = sums[:, 0].reshape(B, C) * (1.0 / HW)                     # exact mean
    h = y @ w1.astype(jnp.float32).T + b1.astype(jnp.float32)
    h = h * jax.nn.sigmoid(h)                                     # SiLU
    g = jax.nn.sigmoid(h @ w2.astype(jnp.float32).T + b2.astype(jnp.float32))
    gates = g.astype(dtype).reshape(R, 1)  # pre-cast: no per-element cast below

    # Phase 3: per-row rescale (pure HBM-bound stream).  Garbage boundary
    # lanes/rows are simply dropped by the clamped output writeback.
    out2 = pl.pallas_call(
        _scale_kernel,
        out_shape=jax.ShapeDtypeStruct((R, HW), dtype),
        grid=grid,
        in_specs=[
            pl.BlockSpec((tr, tc), lambda i, j: (i, j)),
            pl.BlockSpec((tr, 1), lambda i, j: (i, 0)),
        ],
        out_specs=pl.BlockSpec((tr, tc), lambda i, j: (i, j)),
        compiler_params=pltpu.CompilerParams(
            dimension_semantics=("parallel", "parallel"),
            vmem_limit_bytes=_VMEM_LIMIT),
    )(x2, gates)
    return out2.reshape(B, C, H, W)


def se_layer_ref(x, w1, b1, w2, b2):
    """Plain-JAX reference mirroring the PyTorch forward."""
    B, C, H, W = x.shape
    y = jnp.mean(x.astype(jnp.float32), axis=(2, 3))              # (B, C)
    y = y @ w1.astype(jnp.float32).T + b1.astype(jnp.float32)
    y = y * jax.nn.sigmoid(y)                                     # SiLU
    y = jax.nn.sigmoid(y @ w2.astype(jnp.float32).T + b2.astype(jnp.float32))
    return (x * y.reshape(B, C, 1, 1).astype(x.dtype)).astype(x.dtype)


def _run_case(key, B, C, H, W, reduction=4, **kw):
    hidden = _make_divisible(C // reduction, 8)
    kx, k1, k2, k3, k4 = jax.random.split(key, 5)
    x = jax.random.normal(kx, (B, C, H, W), dtype=jnp.float32)
    # PyTorch nn.Linear layout: (out_features, in_features).
    w1 = jax.random.normal(k1, (hidden, C), dtype=jnp.float32) * 0.1
    b1 = jax.random.normal(k2, (hidden,), dtype=jnp.float32) * 0.1
    w2 = jax.random.normal(k3, (C, hidden), dtype=jnp.float32) * 0.1
    b2 = jax.random.normal(k4, (C,), dtype=jnp.float32) * 0.1

    out = jax.block_until_ready(se_layer(x, w1, b1, w2, b2, **kw))
    ref = se_layer_ref(x, w1, b1, w2, b2)
    assert out.shape == (B, C, H, W)
    # 2e-3 tolerance: the fused path's tiny MLP runs on the MXU inside the
    # kernel and may use a different f32-matmul pass count than XLA's
    # reference dot; structural/gating bugs would be orders of magnitude off.
    assert jnp.allclose(out, ref, atol=2e-3, rtol=2e-3), "mismatch vs reference"


if __name__ == "__main__":
    key = jax.random.PRNGKey(0)
    k0, k1, k2, k3 = jax.random.split(key, 4)

    # Fused single-pass path; shapes consistent with SELayer(4, 4, reduction=4).
    _run_case(k0, B=2, C=4, H=16, W=16)
    # Fused path with non-aligned C/HW and a ragged batch tail (B % tb != 0).
    _run_case(k1, B=3, C=5, H=10, W=10)
    # Two-pass streaming fallback (forced), aligned spatial size.
    _run_case(k2, B=2, C=4, H=16, W=16, fused_slab_limit_bytes=0)
    # Two-pass fallback with ragged column tail (HW=100 < 128) and row split.
    _run_case(k3, B=2, C=5, H=10, W=10, fused_slab_limit_bytes=0)

    print("KERNEL_OK")
</pallas_src>

<mosaic_0001>
module attributes {stable_mosaic.version = 11 : i64} {
  func.func @kernel(%arg0: i32, %arg1: memref<1x4x256xf32, #tpu.memory_space<vmem>>, %arg2: memref<4x8xf32, #tpu.memory_space<vmem>>, %arg3: memref<1x8xf32, #tpu.memory_space<vmem>>, %arg4: memref<8x4xf32, #tpu.memory_space<vmem>>, %arg5: memref<1x4xf32, #tpu.memory_space<vmem>>, %arg6: memref<1x4x256xf32, #tpu.memory_space<vmem>>) attributes {dimension_semantics = [#tpu.dimension_semantics<parallel>], iteration_bounds = array<i64: 2>, scalar_prefetch = 0 : i64, scratch_operands = 0 : i64, tpu.core_type = #tpu.core_type<tc>, window_params = [{transform_indices = @transform_0, window_bounds = array<i64: 1, 4, 256>}, {pipeline_mode = #tpu.pipeline_mode<synchronous>, transform_indices = @transform_1, window_bounds = array<i64: 4, 8>}, {pipeline_mode = #tpu.pipeline_mode<synchronous>, transform_indices = @transform_2, window_bounds = array<i64: 1, 8>}, {pipeline_mode = #tpu.pipeline_mode<synchronous>, transform_indices = @transform_3, window_bounds = array<i64: 8, 4>}, {pipeline_mode = #tpu.pipeline_mode<synchronous>, transform_indices = @transform_4, window_bounds = array<i64: 1, 4>}, {transform_indices = @transform_5, window_bounds = array<i64: 1, 4, 256>}]} {
    %c0 = arith.constant 0 : index
    %c0_0 = arith.constant 0 : index
    %c0_1 = arith.constant 0 : index
    %0 = vector.load %arg1[%c0, %c0_0, %c0_1] : memref<1x4x256xf32, #tpu.memory_space<vmem>>, vector<1x4x256xf32>
    %cst = arith.constant dense<0.000000e+00> : vector<1x4xf32>
    %1 = vector.multi_reduction <add>, %0, %cst [2] : vector<1x4x256xf32> to vector<1x4xf32>
    %cst_2 = arith.constant 3.906250e-03 : f32
    %2 = vector.broadcast %cst_2 : f32 to vector<1x4xf32>
    %3 = arith.mulf %1, %2 : vector<1x4xf32>
    %c0_3 = arith.constant 0 : index
    %c0_4 = arith.constant 0 : index
    %4 = vector.load %arg2[%c0_3, %c0_4] : memref<4x8xf32, #tpu.memory_space<vmem>>, vector<4x8xf32>
    %cst_5 = arith.constant dense<0.000000e+00> : vector<1x8xf32>
    %5 = tpu.matmul %3, %4, %cst_5 {dimension_numbers = #tpu.dot_dimension_numbers<[1], [0], [0], [1], [0, 0, 1, 1], [], []>} : vector<1x4xf32>, vector<4x8xf32>, vector<1x8xf32> -> vector<1x8xf32>
    %c0_6 = arith.constant 0 : index
    %c0_7 = arith.constant 0 : index
    %6 = vector.load %arg3[%c0_6, %c0_7] : memref<1x8xf32, #tpu.memory_space<vmem>>, vector<1x8xf32>
    %7 = arith.addf %5, %6 : vector<1x8xf32>
    %8 = arith.negf %7 : vector<1x8xf32>
    %9 = math.exp %8 : vector<1x8xf32>
    %cst_8 = arith.constant 1.000000e+00 : f32
    %10 = vector.broadcast %cst_8 : f32 to vector<1x8xf32>
    %11 = arith.addf %10, %9 : vector<1x8xf32>
    %12 = arith.divf %10, %11 : vector<1x8xf32>
    %13 = arith.mulf %7, %12 : vector<1x8xf32>
    %c0_9 = arith.constant 0 : index
    %c0_10 = arith.constant 0 : index
    %14 = vector.load %arg4[%c0_9, %c0_10] : memref<8x4xf32, #tpu.memory_space<vmem>>, vector<8x4xf32>
    %cst_11 = arith.constant dense<0.000000e+00> : vector<1x4xf32>
    %15 = tpu.matmul %13, %14, %cst_11 {dimension_numbers = #tpu.dot_dimension_numbers<[1], [0], [0], [1], [0, 0, 1, 1], [], []>} : vector<1x8xf32>, vector<8x4xf32>, vector<1x4xf32> -> vector<1x4xf32>
    %c0_12 = arith.constant 0 : index
    %c0_13 = arith.constant 0 : index
    %16 = vector.load %arg5[%c0_12, %c0_13] : memref<1x4xf32, #tpu.memory_space<vmem>>, vector<1x4xf32>
    %17 = arith.addf %15, %16 : vector<1x4xf32>
    %18 = arith.negf %17 : vector<1x4xf32>
    %19 = math.exp %18 : vector<1x4xf32>
    %cst_14 = arith.constant 1.000000e+00 : f32
    %20 = vector.broadcast %cst_14 : f32 to vector<1x4xf32>
    %21 = arith.addf %20, %19 : vector<1x4xf32>
    %22 = arith.divf %20, %21 : vector<1x4xf32>
    %23 = vector.shape_cast %22 : vector<1x4xf32> to vector<1x4x1xf32>
    %24 = vector.broadcast %23 : vector<1x4x1xf32> to vector<1x4x256xf32>
    %25 = arith.mulf %0, %24 : vector<1x4x256xf32>
    %c0_15 = arith.constant 0 : index
    %c0_16 = arith.constant 0 : index
    %c0_17 = arith.constant 0 : index
    %26 = vector.load %arg6[%c0_15, %c0_16, %c0_17] : memref<1x4x256xf32, #tpu.memory_space<vmem>>, vector<1x4x256xf32>
    tpu.vector_store %arg6[%c0_15, %c0_16, %c0_17], %25 {strides = array<i32>} : memref<1x4x256xf32, #tpu.memory_space<vmem>>, vector<1x4x256xf32>,
    return
  }
  func.func @transform_0(%arg0: i32) -> (i32, i32, i32) {
    %c0_i32 = arith.constant 0 : i32
    %c0_i32_0 = arith.constant 0 : i32
    %c0_i32_1 = arith.constant 0 : i32
    return %arg0, %c0_i32, %c0_i32_0 : i32, i32, i32
  }
  func.func @transform_1(%arg0: i32) -> (i32, i32) {
    %c0_i32 = arith.constant 0 : i32
    %c0_i32_0 = arith.constant 0 : i32
    %c0_i32_1 = arith.constant 0 : i32
    return %c0_i32, %c0_i32_0 : i32, i32
  }
  func.func @transform_2(%arg0: i32) -> (i32, i32) {
    %c0_i32 = arith.constant 0 : i32
    %c0_i32_0 = arith.constant 0 : i32
    %c0_i32_1 = arith.constant 0 : i32
    return %c0_i32, %c0_i32_0 : i32, i32
  }
  func.func @transform_3(%arg0: i32) -> (i32, i32) {
    %c0_i32 = arith.constant 0 : i32
    %c0_i32_0 = arith.constant 0 : i32
    %c0_i32_1 = arith.constant 0 : i32
    return %c0_i32, %c0_i32_0 : i32, i32
  }
  func.func @transform_4(%arg0: i32) -> (i32, i32) {
    %c0_i32 = arith.constant 0 : i32
    %c0_i32_0 = arith.constant 0 : i32
    %c0_i32_1 = arith.constant 0 : i32
    return %c0_i32, %c0_i32_0 : i32, i32
  }
  func.func @transform_5(%arg0: i32) -> (i32, i32, i32) {
    %c0_i32 = arith.constant 0 : i32
    %c0_i32_0 = arith.constant 0 : i32
    %c0_i32_1 = arith.constant 0 : i32
    return %arg0, %c0_i32, %c0_i32_0 : i32, i32, i32
  }
}

</mosaic_0001>

<bundles_post_ra>
// kernel: tpu_custom_call.1
= control target key start
LH: loop header
LB: loop body
LE: loop exit
PB: predicated region body
PF: predicated region fallthrough
CT: control target
= control target key end

     0   :  { %10 = vsyncpa [#allocation3], 0  ;;  %s809_s0 = inlined_call_operand.hbm [shape: f32[2,4,256], index: 0, kind: input, shape index: {}]   ;;  %s810_s1 = inlined_call_operand.vmem [shape: f32[4,8], index: 1, kind: input, shape index: {}]   ;;  %s811_s2 = inlined_call_operand.vmem [shape: f32[1,8], index: 2, kind: input, shape index: {}]   ;;  %s812_s3 = inlined_call_operand.vmem [shape: f32[8,4], index: 3, kind: input, shape index: {}]   ;;  %s813_s4 = inlined_call_operand.vmem [shape: f32[1,4], index: 4, kind: input, shape index: {}]   ;;  %s814_s5 = inlined_call_operand.hbm [shape: f32[2,4,256], index: 5, kind: output, shape index: {}]  }
   0x1   :  { %12 = vsyncpa [#allocation3 + $0x1], 0 }
   0x2   :  { %13 = vsyncpa [#allocation4], 0 }
   0x3   :  { %15 = vsyncpa [#allocation4 + $0x1], 0  ;;  %s662_s18 = smov 0   ;;  %s664_s19 = smov 0  }
   0x4   :  { %s666_s20 = smov 0   ;;  %s668_s21 = smov 0  }
   0x5 LB: > { %s683_s22 = sadd.s32 4294967295, %s629_s21   ;;  %s456_s23 = sadd.s32 4294967294, %s629_s21   ;;  %s629_s21 = sphi %s668_s21, %s824_s21   ;;  %s625_s20 = sphi %s666_s20, %s823_s20   ;;  %s621_s19 = sphi %s664_s19, %s822_s19   ;;  %s617_s18 = sphi %s662_s18, %s821_s18  }
   0x6   : > { %s687_s24 = sadd.s32 1, %s629_s21   ;;  %s28_s25 = sadd.s32 1, %s625_s20 }
   0x7   : > { %s25_s26 = ssub.s32 %s629_s21, %s687_s24  ;;  %p35_p0 = scmp.ne.s32.totalorder %s625_s20, %s621_s19 }
   0x8   : > { %p26_p1 = scmp.eq.s32.totalorder %s25_s26, 0  ;;  %p36_p2 = scmp.eq.s32.totalorder %s629_s21, 0 }
   0x9   : > { %p41_p3 = scmp.ne.s32.totalorder %s621_s19, %s617_s18  ;;  %p42_p4 = scmp.eq.s32.totalorder %s683_s22, 0 }
   0xa   : > { %s699_s27 = scalar_select %p26_p1, %s625_s20, %s28_s25  }
   0xb   : > { %p701_p5 = por %p36_p2, %p35_p0  ;;  %p705_p6 = por %p42_p4, %p41_p3 }
   0xc   : > { %p149_p7 = scmp.eq.s32.totalorder %s683_s22, 1  ;;  %p155_p8 = scmp.eq.s32.totalorder %s456_s23, 1 }
   0xd   : > { %p489_p10 = scmp.lt.s32.totalorder %s629_s21, 2  ;;  %s187_s7 = sand.u32 1, %s625_s20  }
   0xe   : > { %p712_p11 = por %p149_p7, %p35_p0  ;;  %p716_p12 = por %p155_p8, %p41_p3 }
   0xf   : > { %s475_s8 = sshll.u32 %s629_s21, 3  ;;  %s459_s9 = sshll.u32 %s187_s7, 3 }
  0x10   : > { %s196_s12 = scalar_lea.hbm %s809_s0, %s475_s8  ;;  %s191_s14 = scalar_lea.vmem [#allocation2], %s459_s9 }
  0x11   : > { %s198_s13 = sshll.u32 %s196_s12, 4  ;;  %s200_s15 = sshll.u32 %s191_s14, 4  ;;  %s199_s13 = int_to_ptr.hbm [resolvable:$true] %s198_s13  ;;  %s201_s15 = int_to_ptr.vmem [resolvable:$true] %s200_s15 }
  0x12   : > { %p727_p13 = pnand %p489_p10, %p701_p5  ;;  %p462_p0 = scmp.ge.s32.totalorder %s629_s21, 1 }
  0x13   : > { %p205_p1 = scmp.lt.s32.totalorder %s629_s21, 3  ;;  %s188_s17 = scalar_lea.sflag [#allocation3], %s187_s7 }
  0x14   : > { %s533_s23 = sshra.s32 %s199_s13, 4  ;;  %p537_p3 = pneg %p727_p13  ;;  %s534_s23 = int_to_ptr.hbm [resolvable:$true] %s533_s23 }
  0x15   : > { %s535_s25 = scalar_lea.hbm %s534_s23, 8  ;;  %s540_s28 = scalar_lea.hbm %s809_s0, 16 }
  0x16   : > { %p536_p2 = scmp.ne.s32.totalorder %s534_s23, %s535_s25  ;;  %p541_p5 = scmp.lt.s32.totalorder %s534_s23, %s809_s0 }
  0x17   : > { %p542_p8 = scmp.lt.s32.totalorder %s540_s28, %s535_s25 }
  0x18   : > { %p538_p4 = pnand %p537_p3, %p536_p2 }
  0x19   : > { %p543_p10 = por %p542_p8, %p541_p5 }
  0x1a   : > { %p539_p7 = pneg %p538_p4 }
  0x1c   : > { %p544_p9 = pnand %p543_p10, %p539_p7 }
  0x1e   : > { %547 = shalt.err (!%p544_p9)
}
  0x1f   : > { %484 = dma.hbm_to_vmem [thread:$0]  (!%p727_p13), %s199_s13, 128, %s201_s15, %s188_s17  }
  0x20   : > { %p206_p2 = pnand %p462_p0, %p205_p1 }
  0x21   : > { %s748_s7 = sand.u32 (!%p206_p2), 1, %s621_s19  }
  0x22   : > { %209 = sbr.rel (%p206_p2) target bundleno = 610 (0x262), region = 40  ;;  %s463_s11 = sshll.u32 (!%p206_p2), %s748_s7, 3 }
  0x23   : > { %s212_s12 = scalar_lea.sflag (!%p206_p2), [#allocation3], %s748_s7  ;;  %s215_s14 = scalar_lea.vmem (!%p206_p2), [#allocation2], %s463_s11 }
  0x27   : > { %608 = dma.done.wait (%p705_p6), %s212_s12, 128  }
  0x28   : > { %610 = vsyncadd (%p705_p6), %s212_s12, 4294967168  ;;  %v758_v0 = vld [vmem:[%s215_s14] sm:$0xff]  ;;  %vm250_vm0 = vcmask 1043456   ;;  %v257_v6 = vld [vmem:[%s810_s1] sm:$0xf]  ;;  %v260_v7 = vlaneseq  ;;  %vm263_vm1 = vcmask 31744  }
  0x29   : > { %245 = vst [vmem:[#allocation1] ss:$2 sm:$0xff] %v758_v0  ;;  %465 = vmatpush.msk.msra.mxu0 %vm250_vm0, %v257_v6  ;;  %v258_v12 = vld [vmem:[%s811_s2] sm:$0x1]  ;;  %vm311_vm6 = vcmask 64512   ;;  %s476_s8 = sshll.u32 %s683_s22, 3 }
  0x2a   : > { %v261_v8 = vand.u32 127, %v260_v7  ;;  %v309_v13 = vld [vmem:[%s812_s3] sm:$0xff]  ;;  %v356_v30 = vshrl.u32 %v260_v7, 7  ;;  %v631_v48 = vmov 839922192   ;;  %s381_s10 = scalar_lea.hbm %s814_s5, %s476_s8  ;;  %s242_s12 = scalar_lea.vmem [#allocation5], %s463_s11 }
  0x2b   : > { %330 = vmatpush.msra.mxu1 %v309_v13  ;;  %v310_v31 = vld [vmem:[%s813_s4] sm:$0x1]  ;;  %v363_v49 = vunpack.c.l.s4 %v631_v48  ;;  %s383_s14 = sshll.u32 %s242_s12, 4  ;;  %s385_s13 = sshll.u32 %s381_s10, 4  ;;  %s384_s14 = int_to_ptr.vmem [resolvable:$true] %s383_s14  ;;  %s386_s13 = int_to_ptr.hbm [resolvable:$true] %s385_s13 }
  0x2c   : > { %524 = vset.pattern.permute.xlu0 %v356_v30  ;;  %s370_s15 = scalar_lea.sflag [#allocation4], %s748_s7  ;;  %s577_s29 = sshra.s32 %s386_s13, 4  ;;  %s578_s29 = int_to_ptr.hbm [resolvable:$true] %s577_s29 }
  0x2d   : > { %v364_v50 = vunpack.c.0.s8 %v363_v49  ;;  %s579_s22 = scalar_lea.hbm %s578_s29, 8  ;;  %s583_s11 = scalar_lea.hbm %s814_s5, 16 }
  0x2e   : > { %p580_p6 = scmp.ne.s32.totalorder %s578_s29, %s579_s22  ;;  %p584_p0 = scmp.lt.s32.totalorder %s578_s29, %s814_s5 }
  0x2f   : > { %p585_p1 = scmp.lt.s32.totalorder %s583_s11, %s579_s22 }
  0x30   : > { %v246_v1 = vld.sshfl [vmem:[#allocation1] sm:$0xff pattern:$0x75316420]  ;;  %v247_v2 = vld.sshfl [vmem:[#allocation1 + $0x8] sm:$0xff pattern:$0x75316420]  ;;  %p581_p9 = pnand %p580_p6, %p712_p11 }
  0x31   : > { %v251_v3 = vsel %vm250_vm0, %v246_v1, 0.0  ;;  %v252_v4 = vsel %vm250_vm0, %v247_v2, 0.0  ;;  %p586_p3 = por %p585_p1, %p584_p0 }
  0x32   : > { %v253_v5 = vadd.f32 %v252_v4, %v251_v3  ;;  %p582_p13 = pneg %p581_p9 }
  0x34   : > { %254 = vadd.xlane.f32.xlu0 %v253_v5  ;;  %p587_p4 = pnand %p586_p3, %p582_p13 }
  0xa7   : > { %v255_v9 = vpop.xlane.xlu0 %254 }
  0xa8   : > { %v256_v10 = vmul.f32 0.00390625, %v255_v9 }
  0xaa   : > { %v262_v11 = vperm.slane %v256_v10, %v261_v8 }
  0xac   : > { %466 = vmatmul.msk.f32.vlgmr.msra.gmra.mxu0 %vm263_vm1, %v262_v11 }
 0x129   : > { %v286_v14 = vpop.f32.mrf.mxu0 }
 0x12a   : > { %v287_v15 = vadd.f32 %v286_v14, %v258_v12 }
 0x12c   : > { %v467_v16 = vmul.f32 -1.442695, %v287_v15 }
 0x12e   : > { %525 = vpow2.f32 %v467_v16 }
 0x134   : > { %v526_v17 = vpop.eup %525 }
 0x135   : > { %v292_v18 = vadd.f32 1.0, %v526_v17 }
 0x137   : > { %527 = vrcp.f32 %v292_v18  ;;  %v304_v22 = vand.u32 2147483648, %v292_v18  ;;  %v302_v24 = vand.u32 2147483647, %v292_v18  ;;  %vm298_vm3 = vweird.f32 %v292_v18 }
 0x139   : > { %v305_v26 = vor.u32 1.1754944e-38, %v304_v22  ;;  %vm303_vm5 = vcmp.eq.f32.partialorder %v302_v24, 8.507059e+37 }
 0x13d   : > { %v528_v19 = vpop.eup %527 }
 0x13e   : > { %v294_v20 = vmul.f32 %v528_v19, %v292_v18  ;;  %vm299_vm2 = vweird.f32 %v528_v19 }
 0x13f   : > { %vm300_vm4 = vmor %vm298_vm3, %vm299_vm2 }
 0x140   : > { %v295_v21 = vsub.f32 1.0, %v294_v20 }
 0x142   : > { %v296_v23 = vmul.f32 %v528_v19, %v295_v21 }
 0x144   : > { %v297_v25 = vadd.f32 %v528_v19, %v296_v23 }
 0x146   : > { %v301_v27 = vsel %vm300_vm4, %v528_v19, %v297_v25 }
 0x147   : > { %v306_v28 = vsel %vm303_vm5, %v305_v26, %v301_v27 }
 0x148   : > { %v308_v29 = vmul.f32 %v306_v28, %v287_v15 }
 0x14a   : > { %468 = vmatmul.msk.f32.vlgmr.msra.gmra.mxu1 %vm311_vm6, %v308_v29 }
 0x1c7   : > { %v332_v32 = vpop.f32.mrf.mxu1 }
 0x1c8   : > { %v333_v33 = vadd.f32 %v332_v32, %v310_v31 }
 0x1ca   : > { %v469_v34 = vmul.f32 -1.442695, %v333_v33 }
 0x1cc   : > { %529 = vpow2.f32 %v469_v34 }
 0x1d2   : > { %v530_v35 = vpop.eup %529 }
 0x1d3   : > { %v338_v36 = vadd.f32 1.0, %v530_v35 }
 0x1d5   : > { %531 = vrcp.f32 %v338_v36  ;;  %v350_v40 = vand.u32 2147483648, %v338_v36  ;;  %v348_v42 = vand.u32 2147483647, %v338_v36  ;;  %vm344_vm8 = vweird.f32 %v338_v36 }
 0x1d7   : > { %v351_v44 = vor.u32 1.1754944e-38, %v350_v40  ;;  %vm349_vm10 = vcmp.eq.f32.partialorder %v348_v42, 8.507059e+37 }
 0x1db   : > { %v532_v37 = vpop.eup %531 }
 0x1dc   : > { %v340_v38 = vmul.f32 %v532_v37, %v338_v36  ;;  %vm345_vm7 = vweird.f32 %v532_v37 }
 0x1dd   : > { %vm346_vm9 = vmor %vm344_vm8, %vm345_vm7 }
 0x1de   : > { %v341_v39 = vsub.f32 1.0, %v340_v38 }
 0x1e0   : > { %v342_v41 = vmul.f32 %v532_v37, %v341_v39 }
 0x1e2   : > { %v343_v43 = vadd.f32 %v532_v37, %v342_v41 }
 0x1e4   : > { %v347_v45 = vsel %vm346_vm9, %v532_v37, %v343_v43 }
 0x1e5   : > { %v352_v46 = vsel %vm349_vm10, %v351_v44, %v347_v45 }
 0x1e6   : > { %v354_v47 = vperm.slane %v352_v46, 0 }
 0x1e8   : > { %359 = vperm.xlu0 %524, %v354_v47  }
 0x25a   : > { %v360_v51 = vpop.permute.xlu0 %359 }
 0x25b   : > { %v365_v52 = vperm.slane %v360_v51, %v364_v50 }
 0x25d   : > { %v367_v53 = vmul.f32 %v365_v52, %v758_v0 }
 0x25f   : > { %368 = vst [vmem:[%s242_s12] sm:$0xff] %v367_v53 }
 0x260   : > { %590 = shalt.err (!%p587_p4)
}
 0x261   : > { %479 = dma.vmem_to_hbm [thread:$0]  (%p712_p11), %s384_s14, 128, %s386_s13, %s370_s15  }
 0x262 PF: > { %s397_s7 = sand.u32 1, %s617_s18   ;;  %p820_p7 = scmp.ge.s32.totalorder %s629_s21, 2 }
 0x263   : > { %s398_s26 = scalar_lea.sflag [#allocation4], %s397_s7 }
 0x264   : > { %p486_p5 = pnand %p820_p7, %p716_p12 }
 0x266   : > { %p487_p8 = pneg %p486_p5 }
 0x268   : > { %612 = dma.done.wait (%p487_p8), %s398_s26, 128  }
 0x269   : > { %614 = vsyncadd (%p487_p8), %s398_s26, 4294967168  ;;  %p18_p10 = scmp.ge.s32.totalorder %s687_s24, 4   ;;  %s821_s18 = smov %s621_s19 }
 0x26a   : > { %s822_s19 = smov %s625_s20  ;;  %s823_s20 = smov %s699_s27 }
 0x26b   : > { %s824_s21 = smov %s687_s24  ;;  %20 = sbr.rel (!%p18_p10) target bundleno = 5 (0x5), region = 85 }
 0x270   :  { %404 = vsyncpa [#allocation3], 1 }
 0x271   :  { %406 = vsyncpa [#allocation3 + $0x1], 1 }
 0x272   :  { %407 = vsyncpa [#allocation4], 1 }
 0x273   :  { %409 = vsyncpa [#allocation4 + $0x1], 1 }

</bundles_post_ra>
